<compile_context>
chip_gen: v7x
topology: tpu7x:2x2x1
jax: 0.10.0
libtpu: 0.0.40
codegen_flags: <defaults>
</compile_context>

<pallas_src>
import functools

import jax
import jax.numpy as jnp
from jax.experimental import pallas as pl
from jax.experimental.pallas import tpu as pltpu


def _round_up(n, m):
    return ((n + m - 1) // m) * m


def mlp_kernel(x_ref, w1_ref, w2_ref, w3_ref, b_ref, o_ref):
    hid = w1_ref.shape[1]
    ncls_p = w3_ref.shape[1]

    biases = b_ref[...]                 # (3, bw) f32, tiny
    b1 = biases[0:1, :hid]
    b2 = biases[1:2, :hid]
    b3 = biases[2:3, :ncls_p]

    # fc1 + ReLU: bf16 operands, f32 accumulation on the MXU, bias add in f32.
    h1 = jnp.dot(x_ref[...], w1_ref[...], preferred_element_type=jnp.float32)
    h1 = jnp.maximum(h1 + b1, 0.0).astype(w2_ref.dtype)
    # fc2 + ReLU
    h2 = jnp.dot(h1, w2_ref[...], preferred_element_type=jnp.float32)
    h2 = jnp.maximum(h2 + b2, 0.0).astype(w3_ref.dtype)
    # fc5 (logits, no activation) -> lane-dense (128-wide) output block.
    out = jnp.dot(h2, w3_ref[...], preferred_element_type=jnp.float32)
    o_ref[...] = (out + b3).astype(o_ref.dtype)


def prepare_params(params, compute_dtype=jnp.bfloat16):
    """Pad/cast the parameters ONCE (hoisted out of the per-forward path).

    Returns a pytree of kernel-ready operands:
      w1 (in, hid) bf16, w2 (hid, hid) bf16, w3 (hid, ncls_p) bf16,
      b  (3, max(hid, ncls_p)) f32  -- rows = [b1, b2, b3(padded)].
    Only the logits dim is padded (to a multiple of 128) so the output store is
    an unmasked lane-dense vst; padded logit columns are provably zero and are
    sliced off in the wrapper.
    """
    w1, b1, w2, b2, w3, b3 = (params["w1"], params["b1"], params["w2"],
                              params["b2"], params["w3"], params["b3"])
    in_dim, hid = w1.shape
    ncls = w3.shape[1]
    ncls_p = _round_up(ncls, 128)
    bw = max(hid, ncls_p)

    w1c = w1.astype(compute_dtype)
    w2c = w2.astype(compute_dtype)
    w3p = (jnp.zeros((hid, ncls_p), compute_dtype)
           .at[:, :ncls].set(w3.astype(compute_dtype)))

    b_all = jnp.zeros((3, bw), jnp.float32)
    b_all = b_all.at[0, :hid].set(b1.reshape(-1).astype(jnp.float32))
    b_all = b_all.at[1, :hid].set(b2.reshape(-1).astype(jnp.float32))
    b_all = b_all.at[2, :ncls].set(b3.reshape(-1).astype(jnp.float32))

    return {"w1": w1c, "w2": w2c, "w3": w3p, "b": b_all}


def _vmem_limit_bytes(requested):
    """Generation-aware VMEM cap: ~85% of per-core VMEM, never below 32 MiB request."""
    cap = 128 * 1024 * 1024
    try:
        info = pltpu.get_tpu_info()
        cap = int(getattr(info, "vmem_capacity_bytes", cap))
    except Exception:
        pass
    ceiling = int(cap * 0.85)           # headroom for compiler internal scratch
    return int(min(max(requested, 32 * 1024 * 1024), ceiling))


def neural_network_forward(x, prepared, num_classes, *, batch_tile=None,
                           single_buffer_weights=True):
    """Pallas implementation of NeuralNetwork.forward.

    x: (B, input_size) float32; prepared: output of prepare_params().
    """
    w1, w2, w3, b_all = prepared["w1"], prepared["w2"], prepared["w3"], prepared["b"]
    B, in_dim = x.shape
    hid = w1.shape[1]
    ncls_p = w3.shape[1]
    compute_dtype = w1.dtype

    # Batch tile: multiple of 8, single grid step for small B, up to 512 rows for
    # large B (grid is a serial loop per-TC; big tiles amortize per-step overhead
    # and the resident weights mean only the x/out tiles grow).
    if batch_tile is None:
        tb = min(512, _round_up(B, 8))
    else:
        tb = min(_round_up(batch_tile, 8), _round_up(B, 8))
    B_p = _round_up(B, tb)
    grid = (B_p // tb,)

    if B_p == B:
        xp = x.astype(compute_dtype)
    else:
        xp = (jnp.zeros((B_p, in_dim), compute_dtype)
              .at[:B, :].set(x.astype(compute_dtype)))

    operands = (xp, w1, w2, w3, b_all)

    # Cost estimate for XLA scheduling around the custom call.
    flops = 2 * B_p * (in_dim * hid + hid * hid + hid * ncls_p)
    bytes_accessed = (sum(int(a.size) * a.dtype.itemsize for a in operands)
                      + B_p * ncls_p * 4)
    cost = pl.CostEstimate(flops=flops, transcendentals=0,
                           bytes_accessed=bytes_accessed)

    # VMEM budget: resident weights (single- or double-buffered) + double-buffered
    # x/out tiles + f32 intermediates.
    weight_bytes = sum(int(a.size) * a.dtype.itemsize for a in (w1, w2, w3, b_all))
    wbuf = 1 if single_buffer_weights else 2
    act_bytes = 2 * (tb * in_dim * xp.dtype.itemsize + tb * ncls_p * 4)
    interm_bytes = 3 * tb * max(hid, ncls_p) * 4
    vmem_limit = _vmem_limit_bytes(wbuf * weight_bytes + act_bytes + interm_bytes)

    def resident_spec(shape):
        # Grid-invariant operand: constant index_map; single-buffer when allowed.
        if single_buffer_weights:
            return pl.BlockSpec(shape, lambda i: (0, 0),
                                pipeline_mode=pl.Buffered(1))
        return pl.BlockSpec(shape, lambda i: (0, 0))

    in_specs = [
        pl.BlockSpec((tb, in_dim), lambda i: (i, 0)),    # x (batch-tiled)
        resident_spec((in_dim, hid)),                    # w1 (resident)
        resident_spec((hid, hid)),                       # w2 (resident)
        resident_spec((hid, ncls_p)),                    # w3 (resident)
        resident_spec(b_all.shape),                      # packed biases (resident)
    ]
    out_spec = pl.BlockSpec((tb, ncls_p), lambda i: (i, 0))  # lane-dense output

    # TODO(synk): on v7x, sharding the batch axis across both TensorCores needs
    # pltpu.CORE_PARALLEL (plain "parallel" vs "arbitrary" is ~neutral); kept
    # generation-agnostic here.
    out_padded = pl.pallas_call(
        mlp_kernel,
        out_shape=jax.ShapeDtypeStruct((B_p, ncls_p), jnp.float32),
        grid_spec=pltpu.PrefetchScalarGridSpec(
            num_scalar_prefetch=0,
            grid=grid,
            in_specs=in_specs,
            out_specs=out_spec,
        ),
        compiler_params=pltpu.CompilerParams(
            dimension_semantics=("parallel",),
            vmem_limit_bytes=vmem_limit,
        ),
        cost_estimate=cost,
    )(*operands)

    return out_padded[:B, :num_classes]


def init_params(key, input_size, hidden_size, num_classes):
    """Deterministic param init (PyTorch-style uniform fan-in bounds)."""
    ks = jax.random.split(key, 6)

    def lin(kw, kb, fan_in, fan_out):
        bound = 1.0 / jnp.sqrt(jnp.float32(fan_in))
        w = jax.random.uniform(kw, (fan_in, fan_out), jnp.float32, -bound, bound)
        b = jax.random.uniform(kb, (1, fan_out), jnp.float32, -bound, bound)
        return w, b

    w1, b1 = lin(ks[0], ks[1], input_size, hidden_size)
    w2, b2 = lin(ks[2], ks[3], hidden_size, hidden_size)
    w3, b3 = lin(ks[4], ks[5], hidden_size, num_classes)
    return {"w1": w1, "b1": b1, "w2": w2, "b2": b2, "w3": w3, "b3": b3}


def reference_forward(x, p, compute_dtype=jnp.float32):
    def lin(a, w, b):
        return jnp.dot(a.astype(compute_dtype), w.astype(compute_dtype),
                       preferred_element_type=jnp.float32) + b.astype(jnp.float32)
    h1 = jnp.maximum(lin(x, p["w1"], p["b1"]), 0.0)
    h2 = jnp.maximum(lin(h1, p["w2"], p["b2"]), 0.0)
    return lin(h2, p["w3"], p["b3"])


if __name__ == "__main__":
    key = jax.random.PRNGKey(0)
    k_x, k_p = jax.random.split(key)

    batch = 16
    input_size = 16
    hidden_size = 32
    num_classes = 5

    x = jax.random.normal(k_x, (batch, input_size), jnp.float32)
    params = init_params(k_p, input_size, hidden_size, num_classes)

    # Pad/cast weights ONCE; forward is jitted and reuses the prepared pytree.
    prepared = jax.tree_util.tree_map(jax.block_until_ready, prepare_params(params))

    def run(single_buffer):
        fwd = jax.jit(functools.partial(neural_network_forward,
                                        num_classes=num_classes,
                                        single_buffer_weights=single_buffer))
        return jax.block_until_ready(fwd(x, prepared))

    try:
        out = run(True)
    except Exception:
        # Fallback if this JAX build rejects pl.Buffered(1) single-buffering.
        out = run(False)

    assert out.shape == (batch, num_classes)

    # Numerics-matched reference (bf16 operands, f32 accumulation): tight check.
    ref_bf16 = reference_forward(x, params, compute_dtype=jnp.bfloat16)
    assert jnp.allclose(out, ref_bf16, atol=2e-3, rtol=2e-3)

    # Original f32 module semantics: looser tolerance for the bf16 cast.
    ref_f32 = reference_forward(x, params, compute_dtype=jnp.float32)
    assert jnp.allclose(out, ref_f32, atol=5e-2, rtol=5e-2)

    print("KERNEL_OK")
</pallas_src>

<mosaic_0001>
module attributes {stable_mosaic.version = 11 : i64} {
  func.func @mlp_kernel(%arg0: i32, %arg1: memref<16x16xbf16, #tpu.memory_space<vmem>>, %arg2: memref<16x32xbf16, #tpu.memory_space<vmem>>, %arg3: memref<32x32xbf16, #tpu.memory_space<vmem>>, %arg4: memref<32x128xbf16, #tpu.memory_space<vmem>>, %arg5: memref<3x128xf32, #tpu.memory_space<vmem>>, %arg6: memref<16x128xf32, #tpu.memory_space<vmem>>) attributes {dimension_semantics = [#tpu.dimension_semantics<parallel>], iteration_bounds = array<i64: 1>, scalar_prefetch = 0 : i64, scratch_operands = 0 : i64, tpu.core_type = #tpu.core_type<tc>, window_params = [{transform_indices = @transform_0, window_bounds = array<i64: 16, 16>}, {pipeline_mode = #tpu.pipeline_mode<synchronous>, transform_indices = @transform_1, window_bounds = array<i64: 16, 32>}, {pipeline_mode = #tpu.pipeline_mode<synchronous>, transform_indices = @transform_2, window_bounds = array<i64: 32, 32>}, {pipeline_mode = #tpu.pipeline_mode<synchronous>, transform_indices = @transform_3, window_bounds = array<i64: 32, 128>}, {pipeline_mode = #tpu.pipeline_mode<synchronous>, transform_indices = @transform_4, window_bounds = array<i64: 3, 128>}, {transform_indices = @transform_5, window_bounds = array<i64: 16, 128>}]} {
    %c0 = arith.constant 0 : index
    %c0_0 = arith.constant 0 : index
    %0 = vector.load %arg5[%c0, %c0_0] : memref<3x128xf32, #tpu.memory_space<vmem>>, vector<3x128xf32>
    %1 = vector.extract_strided_slice %0 {offsets = [0, 0], sizes = [1, 32], strides = [1, 1]} : vector<3x128xf32> to vector<1x32xf32>
    %2 = vector.extract_strided_slice %0 {offsets = [1, 0], sizes = [1, 32], strides = [1, 1]} : vector<3x128xf32> to vector<1x32xf32>
    %3 = vector.extract_strided_slice %0 {offsets = [2, 0], sizes = [1, 128], strides = [1, 1]} : vector<3x128xf32> to vector<1x128xf32>
    %c0_1 = arith.constant 0 : index
    %c0_2 = arith.constant 0 : index
    %4 = vector.load %arg1[%c0_1, %c0_2] : memref<16x16xbf16, #tpu.memory_space<vmem>>, vector<16x16xbf16>
    %c0_3 = arith.constant 0 : index
    %c0_4 = arith.constant 0 : index
    %5 = vector.load %arg2[%c0_3, %c0_4] : memref<16x32xbf16, #tpu.memory_space<vmem>>, vector<16x32xbf16>
    %cst = arith.constant dense<0.000000e+00> : vector<16x32xf32>
    %6 = tpu.matmul %4, %5, %cst {dimension_numbers = #tpu.dot_dimension_numbers<[1], [0], [0], [1], [0, 0, 1, 1], [], []>} : vector<16x16xbf16>, vector<16x32xbf16>, vector<16x32xf32> -> vector<16x32xf32>
    %7 = vector.broadcast %1 : vector<1x32xf32> to vector<16x32xf32>
    %8 = arith.addf %6, %7 : vector<16x32xf32>
    %cst_5 = arith.constant 0.000000e+00 : f32
    %9 = vector.broadcast %cst_5 : f32 to vector<16x32xf32>
    %10 = arith.maximumf %8, %9 : vector<16x32xf32>
    %11 = arith.truncf %10 : vector<16x32xf32> to vector<16x32xbf16>
    %c0_6 = arith.constant 0 : index
    %c0_7 = arith.constant 0 : index
    %12 = vector.load %arg3[%c0_6, %c0_7] : memref<32x32xbf16, #tpu.memory_space<vmem>>, vector<32x32xbf16>
    %cst_8 = arith.constant dense<0.000000e+00> : vector<16x32xf32>
    %13 = tpu.matmul %11, %12, %cst_8 {dimension_numbers = #tpu.dot_dimension_numbers<[1], [0], [0], [1], [0, 0, 1, 1], [], []>} : vector<16x32xbf16>, vector<32x32xbf16>, vector<16x32xf32> -> vector<16x32xf32>
    %14 = vector.broadcast %2 : vector<1x32xf32> to vector<16x32xf32>
    %15 = arith.addf %13, %14 : vector<16x32xf32>
    %cst_9 = arith.constant 0.000000e+00 : f32
    %16 = vector.broadcast %cst_9 : f32 to vector<16x32xf32>
    %17 = arith.maximumf %15, %16 : vector<16x32xf32>
    %18 = arith.truncf %17 : vector<16x32xf32> to vector<16x32xbf16>
    %c0_10 = arith.constant 0 : index
    %c0_11 = arith.constant 0 : index
    %19 = vector.load %arg4[%c0_10, %c0_11] : memref<32x128xbf16, #tpu.memory_space<vmem>>, vector<32x128xbf16>
    %cst_12 = arith.constant dense<0.000000e+00> : vector<16x128xf32>
    %20 = tpu.matmul %18, %19, %cst_12 {dimension_numbers = #tpu.dot_dimension_numbers<[1], [0], [0], [1], [0, 0, 1, 1], [], []>} : vector<16x32xbf16>, vector<32x128xbf16>, vector<16x128xf32> -> vector<16x128xf32>
    %21 = vector.broadcast %3 : vector<1x128xf32> to vector<16x128xf32>
    %22 = arith.addf %20, %21 : vector<16x128xf32>
    %c0_13 = arith.constant 0 : index
    %c0_14 = arith.constant 0 : index
    %23 = vector.load %arg6[%c0_13, %c0_14] : memref<16x128xf32, #tpu.memory_space<vmem>>, vector<16x128xf32>
    tpu.vector_store %arg6[%c0_13, %c0_14], %22 {strides = array<i32>} : memref<16x128xf32, #tpu.memory_space<vmem>>, vector<16x128xf32>,
    return
  }
  func.func @transform_0(%arg0: i32) -> (i32, i32) {
    %c0_i32 = arith.constant 0 : i32
    %c0_i32_0 = arith.constant 0 : i32
    return %arg0, %c0_i32 : i32, i32
  }
  func.func @transform_1(%arg0: i32) -> (i32, i32) {
    %c0_i32 = arith.constant 0 : i32
    %c0_i32_0 = arith.constant 0 : i32
    %c0_i32_1 = arith.constant 0 : i32
    return %c0_i32, %c0_i32_0 : i32, i32
  }
  func.func @transform_2(%arg0: i32) -> (i32, i32) {
    %c0_i32 = arith.constant 0 : i32
    %c0_i32_0 = arith.constant 0 : i32
    %c0_i32_1 = arith.constant 0 : i32
    return %c0_i32, %c0_i32_0 : i32, i32
  }
  func.func @transform_3(%arg0: i32) -> (i32, i32) {
    %c0_i32 = arith.constant 0 : i32
    %c0_i32_0 = arith.constant 0 : i32
    %c0_i32_1 = arith.constant 0 : i32
    return %c0_i32, %c0_i32_0 : i32, i32
  }
  func.func @transform_4(%arg0: i32) -> (i32, i32) {
    %c0_i32 = arith.constant 0 : i32
    %c0_i32_0 = arith.constant 0 : i32
    %c0_i32_1 = arith.constant 0 : i32
    return %c0_i32, %c0_i32_0 : i32, i32
  }
  func.func @transform_5(%arg0: i32) -> (i32, i32) {
    %c0_i32 = arith.constant 0 : i32
    %c0_i32_0 = arith.constant 0 : i32
    return %arg0, %c0_i32 : i32, i32
  }
}

module attributes {stable_mosaic.version = 11 : i64} {
  func.func @mlp_kernel(%arg0: i32, %arg1: memref<16x16xbf16, #tpu.memory_space<vmem>>, %arg2: memref<16x32xbf16, #tpu.memory_space<vmem>>, %arg3: memref<32x32xbf16, #tpu.memory_space<vmem>>, %arg4: memref<32x128xbf16, #tpu.memory_space<vmem>>, %arg5: memref<3x128xf32, #tpu.memory_space<vmem>>, %arg6: memref<16x128xf32, #tpu.memory_space<vmem>>) attributes {dimension_semantics = [#tpu.dimension_semantics<parallel>], iteration_bounds = array<i64: 1>, scalar_prefetch = 0 : i64, scratch_operands = 0 : i64, tpu.core_type = #tpu.core_type<tc>, window_params = [{transform_indices = @transform_0, window_bounds = array<i64: 16, 16>}, {pipeline_mode = #tpu.pipeline_mode<synchronous>, transform_indices = @transform_1, window_bounds = array<i64: 16, 32>}, {pipeline_mode = #tpu.pipeline_mode<synchronous>, transform_indices = @transform_2, window_bounds = array<i64: 32, 32>}, {pipeline_mode = #tpu.pipeline_mode<synchronous>, transform_indices = @transform_3, window_bounds = array<i64: 32, 128>}, {pipeline_mode = #tpu.pipeline_mode<synchronous>, transform_indices = @transform_4, window_bounds = array<i64: 3, 128>}, {transform_indices = @transform_5, window_bounds = array<i64: 16, 128>}]} {
    %c0 = arith.constant 0 : index
    %c0_0 = arith.constant 0 : index
    %0 = vector.load %arg5[%c0, %c0_0] : memref<3x128xf32, #tpu.memory_space<vmem>>, vector<3x128xf32>
    %1 = vector.extract_strided_slice %0 {offsets = [0, 0], sizes = [1, 32], strides = [1, 1]} : vector<3x128xf32> to vector<1x32xf32>
    %2 = vector.extract_strided_slice %0 {offsets = [1, 0], sizes = [1, 32], strides = [1, 1]} : vector<3x128xf32> to vector<1x32xf32>
    %3 = vector.extract_strided_slice %0 {offsets = [2, 0], sizes = [1, 128], strides = [1, 1]} : vector<3x128xf32> to vector<1x128xf32>
    %c0_1 = arith.constant 0 : index
    %c0_2 = arith.constant 0 : index
    %4 = vector.load %arg1[%c0_1, %c0_2] : memref<16x16xbf16, #tpu.memory_space<vmem>>, vector<16x16xbf16>
    %c0_3 = arith.constant 0 : index
    %c0_4 = arith.constant 0 : index
    %5 = vector.load %arg2[%c0_3, %c0_4] : memref<16x32xbf16, #tpu.memory_space<vmem>>, vector<16x32xbf16>
    %cst = arith.constant dense<0.000000e+00> : vector<16x32xf32>
    %6 = tpu.matmul %4, %5, %cst {dimension_numbers = #tpu.dot_dimension_numbers<[1], [0], [0], [1], [0, 0, 1, 1], [], []>} : vector<16x16xbf16>, vector<16x32xbf16>, vector<16x32xf32> -> vector<16x32xf32>
    %7 = vector.broadcast %1 : vector<1x32xf32> to vector<16x32xf32>
    %8 = arith.addf %6, %7 : vector<16x32xf32>
    %cst_5 = arith.constant 0.000000e+00 : f32
    %9 = vector.broadcast %cst_5 : f32 to vector<16x32xf32>
    %10 = arith.maximumf %8, %9 : vector<16x32xf32>
    %11 = arith.truncf %10 : vector<16x32xf32> to vector<16x32xbf16>
    %c0_6 = arith.constant 0 : index
    %c0_7 = arith.constant 0 : index
    %12 = vector.load %arg3[%c0_6, %c0_7] : memref<32x32xbf16, #tpu.memory_space<vmem>>, vector<32x32xbf16>
    %cst_8 = arith.constant dense<0.000000e+00> : vector<16x32xf32>
    %13 = tpu.matmul %11, %12, %cst_8 {dimension_numbers = #tpu.dot_dimension_numbers<[1], [0], [0], [1], [0, 0, 1, 1], [], []>} : vector<16x32xbf16>, vector<32x32xbf16>, vector<16x32xf32> -> vector<16x32xf32>
    %14 = vector.broadcast %2 : vector<1x32xf32> to vector<16x32xf32>
    %15 = arith.addf %13, %14 : vector<16x32xf32>
    %cst_9 = arith.constant 0.000000e+00 : f32
    %16 = vector.broadcast %cst_9 : f32 to vector<16x32xf32>
    %17 = arith.maximumf %15, %16 : vector<16x32xf32>
    %18 = arith.truncf %17 : vector<16x32xf32> to vector<16x32xbf16>
    %c0_10 = arith.constant 0 : index
    %c0_11 = arith.constant 0 : index
    %19 = vector.load %arg4[%c0_10, %c0_11] : memref<32x128xbf16, #tpu.memory_space<vmem>>, vector<32x128xbf16>
    %cst_12 = arith.constant dense<0.000000e+00> : vector<16x128xf32>
    %20 = tpu.matmul %18, %19, %cst_12 {dimension_numbers = #tpu.dot_dimension_numbers<[1], [0], [0], [1], [0, 0, 1, 1], [], []>} : vector<16x32xbf16>, vector<32x128xbf16>, vector<16x128xf32> -> vector<16x128xf32>
    %21 = vector.broadcast %3 : vector<1x128xf32> to vector<16x128xf32>
    %22 = arith.addf %20, %21 : vector<16x128xf32>
    %c0_13 = arith.constant 0 : index
    %c0_14 = arith.constant 0 : index
    %23 = vector.load %arg6[%c0_13, %c0_14] : memref<16x128xf32, #tpu.memory_space<vmem>>, vector<16x128xf32>
    tpu.vector_store %arg6[%c0_13, %c0_14], %22 {strides = array<i32>} : memref<16x128xf32, #tpu.memory_space<vmem>>, vector<16x128xf32>,
    return
  }
  func.func @transform_0(%arg0: i32) -> (i32, i32) {
    %c0_i32 = arith.constant 0 : i32
    %c0_i32_0 = arith.constant 0 : i32
    return %arg0, %c0_i32 : i32, i32
  }
  func.func @transform_1(%arg0: i32) -> (i32, i32) {
    %c0_i32 = arith.constant 0 : i32
    %c0_i32_0 = arith.constant 0 : i32
    %c0_i32_1 = arith.constant 0 : i32
    return %c0_i32, %c0_i32_0 : i32, i32
  }
  func.func @transform_2(%arg0: i32) -> (i32, i32) {
    %c0_i32 = arith.constant 0 : i32
    %c0_i32_0 = arith.constant 0 : i32
    %c0_i32_1 = arith.constant 0 : i32
    return %c0_i32, %c0_i32_0 : i32, i32
  }
  func.func @transform_3(%arg0: i32) -> (i32, i32) {
    %c0_i32 = arith.constant 0 : i32
    %c0_i32_0 = arith.constant 0 : i32
    %c0_i32_1 = arith.constant 0 : i32
    return %c0_i32, %c0_i32_0 : i32, i32
  }
  func.func @transform_4(%arg0: i32) -> (i32, i32) {
    %c0_i32 = arith.constant 0 : i32
    %c0_i32_0 = arith.constant 0 : i32
    %c0_i32_1 = arith.constant 0 : i32
    return %c0_i32, %c0_i32_0 : i32, i32
  }
  func.func @transform_5(%arg0: i32) -> (i32, i32) {
    %c0_i32 = arith.constant 0 : i32
    %c0_i32_0 = arith.constant 0 : i32
    return %arg0, %c0_i32 : i32, i32
  }
}

</mosaic_0001>

<bundles_post_ra>
// kernel: neural_network_forward.1
= control target key start
LH: loop header
LB: loop body
LE: loop exit
PB: predicated region body
PF: predicated region fallthrough
CT: control target
= control target key end

     0   :  { %10 = vsyncpa [#allocation3], 0  ;;  %s437_s0 = inlined_call_operand.vmem [shape: bf16[16,16], index: 0, kind: input, shape index: {}]   ;;  %s438_s1 = inlined_call_operand.hbm [shape: bf16[16,32], index: 1, kind: input, shape index: {}]   ;;  %s439_s2 = inlined_call_operand.vmem [shape: bf16[32,32], index: 2, kind: input, shape index: {}]   ;;  %s440_s3 = inlined_call_operand.vmem [shape: bf16[32,128], index: 3, kind: input, shape index: {}]   ;;  %s441_s4 = inlined_call_operand.hbm [shape: f32[3,128], index: 4, kind: input, shape index: {}]   ;;  %s442_s5 = inlined_call_operand.vmem [shape: f32[16,128], index: 5, kind: output, shape index: {}]  }
   0x1   :  { %11 = vsyncpa [#allocation5], 0  ;;  %s354_s18 = smov [#allocation2]   ;;  %s306_s22 = scalar_lea.hbm %s438_s1, 128 }
   0x2   :  { %s19_s19 = sshll.u32 %s354_s18, 4  ;;  %p307_p0 = scmp.ne.s32.totalorder %s438_s1, %s306_s22  ;;  %s20_s19 = int_to_ptr.vmem [resolvable:$true] %s19_s19 }
   0x3   :  { %p310_p1 = scmp.lt.u32.totalorder %s306_s22, %s438_s1 }
   0x5   :  { %p312_p2 = pnand %p310_p1, %p307_p0 }
   0x7   :  { %315 = shalt.err (!%p312_p2)
}
   0x8   :  { %s316_s27 = scalar_lea.vmem %s20_s19, 128  ;;  %p321_p4 = scmp.lt.s32.totalorder %s20_s19, %s20_s19 }
   0x9   :  { %p317_p3 = scmp.ne.s32.totalorder %s20_s19, %s316_s27  ;;  %p322_p5 = scmp.lt.s32.totalorder %s316_s27, %s316_s27 }
   0xb   :  { %p323_p6 = por %p322_p5, %p321_p4 }
   0xd   :  { %p324_p7 = pnand %p323_p6, %p317_p3 }
   0xf   :  { %327 = shalt.err (!%p324_p7)
}
  0x10   :  { %s355_s28 = smov 64   ;;  %s356_s29 = smov 4  }
  0x11   :  { %25 = dma.hbm_to_vmem [thread:$0]  %s438_s1, 128, %s20_s19, [#allocation3], %s355_s28, %s355_s28, %s356_s29  }
  0x12   :  { %s357_s7 = smov [#allocation4]   ;;  %s328_s11 = scalar_lea.hbm %s441_s4, 64 }
  0x13   :  { %s36_s8 = sshll.u32 %s357_s7, 4  ;;  %p329_p8 = scmp.ne.s32.totalorder %s441_s4, %s328_s11  ;;  %s37_s8 = int_to_ptr.vmem [resolvable:$true] %s36_s8 }
  0x14   :  { %p332_p9 = scmp.lt.u32.totalorder %s328_s11, %s441_s4 }
  0x16   :  { %p334_p10 = pnand %p332_p9, %p329_p8 }
  0x18   :  { %337 = shalt.err (!%p334_p10)
}
  0x19   :  { %s338_s16 = scalar_lea.vmem %s37_s8, 64  ;;  %p343_p12 = scmp.lt.s32.totalorder %s37_s8, %s37_s8 }
  0x1a   :  { %p339_p11 = scmp.ne.s32.totalorder %s37_s8, %s338_s16  ;;  %p344_p13 = scmp.lt.s32.totalorder %s338_s16, %s338_s16 }
  0x1c   :  { %p345_p0 = por %p344_p13, %p343_p12 }
  0x1e   :  { %p346_p1 = pnand %p345_p0, %p339_p11 }
  0x20   :  { %349 = shalt.err (!%p346_p1)
}
  0x21   :  { %39 = dma.hbm_to_vmem [thread:$0]  %s441_s4, 64, %s37_s8, [#allocation5]  }
  0x22   :  { %350 = dma.done.wait [#allocation3], 128  }
  0x23   :  { %351 = vsyncadd [#allocation3], 4294967168 }
  0x24   :  { %352 = dma.done.wait [#allocation5], 64  }
  0x25   :  { %353 = vsyncadd [#allocation5], 4294967232  ;;  %v358_v0 = vmov 0.0   ;;  %vm359_vm0 = vmmov 0   ;;  %v300_v1 = vld [vmem:[#allocation2] sm:$0xff]   ;;  %vm67_vm1 = vcmask 130048   ;;  %v52_v5 = vlaneseq }
  0x26   :  { %272 = vmatprep.subr.bf16.mxu0 %v358_v0  ;;  %274 = vmatprep.mubr.msk.bf16.mxu0 %vm359_vm0, %v358_v0  ;;  %v301_v2 = vld [vmem:[%s437_s0] sm:$0xff]   ;;  %v303_v4 = vld [vmem:[%s439_s2 + $0x8] sm:$0xff]   ;;  %vm135_vm2 = vcmask 261120  }
  0x27   :  { %278 = vmatprep.subr.bf16.mxu1 %v358_v0  ;;  %282 = vmatprep.mubr.msk.bf16.mxu1 %vm359_vm0, %v358_v0  ;;  %v302_v3 = vld [vmem:[%s439_s2] sm:$0xff]   ;;  %v53_v6 = vshrl.u32 %v52_v5, 7  ;;  %v47_v8 = vld [vmem:[#allocation4] sm:$0x7] }
  0x28   :  { %273 = vmatpush3.bf16.msra.mxu0 %v300_v1  ;;  %279 = vmatpush3.bf16.msra.mxu1 %v302_v3  ;;  %v304_v19 = vld [vmem:[%s440_s3] sm:$0xff]   ;;  %v305_v20 = vld [vmem:[%s440_s3 + $0x8] sm:$0xff]  }
  0x29   :  { %286 = vmatprep.subr.bf16.mxu0 %v358_v0  ;;  %280 = vmatprep.subr.bf16.mxu1 %v358_v0  ;;  %v54_v7 = vsub.s32 0, %v53_v6  ;;  %v121_v21 = vsub.s32 1, %v53_v6  ;;  %v189_v32 = vsub.s32 2, %v53_v6 }
  0x2b   :  { %275 = vmatmul.mubr.msk.bf16.vlgmr.msra.gmra.mrb[0].mxu0 %vm67_vm1, %v301_v2  ;;  %v55_v9 = vrot.slane %v47_v8, %v54_v7  ;;  %v122_v22 = vrot.slane %v47_v8, %v121_v21  ;;  %v190_v33 = vrot.slane %v47_v8, %v189_v32 }
  0x2c   :  { %290 = vmatprep.mubr.msk.bf16.mxu0 %vm359_vm0, %v358_v0  ;;  %281 = vmatpush3.bf16.msra.mxu1 %v303_v4 }
  0x2d   :  { %287 = vmatpush3.bf16.msra.mxu0 %v304_v19 }
  0x2e   :  { %288 = vmatprep.subr.bf16.mxu0 %v358_v0 }
  0x31   :  { %289 = vmatpush3.bf16.msra.mxu0 %v305_v20 }
  0xfe   :  { %v105_v10 = vpop.f32.mrb[0].mxu0 }
  0xff   :  { %v106_v11 = vadd.f32 %v105_v10, %v55_v9  ;;  %v276_v12 = vpop.f32.mrb[1].mxu0 }
 0x100   :  { %v108_v13 = vpop.f32.mrb[2].mxu0 }
 0x101   :  { %v109_v14 = vadd.f32 %v108_v13, %v55_v9  ;;  %v277_v15 = vpop.f32.mrb[3].mxu0  ;;  %v112_v16 = vmax.f32 %v106_v11, 0.0 }
 0x103   :  { %v113_v17 = vmax.f32 %v109_v14, 0.0 }
 0x105   :  { %v114_v18 = vpack.c.bf16 %v113_v17, %v112_v16 }
 0x107   :  { %283 = vmatmul.mubr.msk.bf16.vlgmr.msra.gmra.mrb[0].mxu1 %vm135_vm2, %v114_v18 }
 0x1da   :  { %v173_v23 = vpop.f32.mrb[0].mxu1 }
 0x1db   :  { %v174_v24 = vadd.f32 %v173_v23, %v122_v22  ;;  %v284_v25 = vpop.f32.mrb[1].mxu1 }
 0x1dc   :  { %v176_v26 = vpop.f32.mrb[2].mxu1 }
 0x1dd   :  { %v177_v27 = vadd.f32 %v176_v26, %v122_v22  ;;  %v285_v28 = vpop.f32.mrb[3].mxu1  ;;  %v180_v29 = vmax.f32 %v174_v24, 0.0 }
 0x1df   :  { %v181_v30 = vmax.f32 %v177_v27, 0.0 }
 0x1e1   :  { %v182_v31 = vpack.c.bf16 %v181_v30, %v180_v29 }
 0x1e3   :  { %291 = vmatmul.mubr.msk.bf16.vlgmr.msra.gmra.mrb[4].mxu0 %vm135_vm2, %v182_v31 }
 0x2b6   :  { %v240_v34 = vpop.f32.mrb[4].mxu0 }
 0x2b7   :  { %v241_v35 = vadd.f32 %v240_v34, %v190_v33  ;;  %v292_v36 = vpop.f32.mrb[5].mxu0 }
 0x2b8   :  { %v243_v37 = vpop.f32.mrb[6].mxu0 }
 0x2b9   :  { %247 = vst [vmem:[%s442_s5] sm:$0xff] %v241_v35  ;;  %v244_v38 = vadd.f32 %v243_v37, %v190_v33  ;;  %v293_v39 = vpop.f32.mrb[7].mxu0 }
 0x2bb   :  { %248 = vst [vmem:[%s442_s5 + $0x8] sm:$0xff] %v244_v38 }
 0x2bc   :  { %253 = vsyncpa [#allocation3], 1 }
 0x2bd   :  { %254 = vsyncpa [#allocation5], 1 }

// kernel: neural_network_forward.1
= control target key start
LH: loop header
LB: loop body
LE: loop exit
PB: predicated region body
PF: predicated region fallthrough
CT: control target
= control target key end

     0   :  { %10 = vsyncpa [#allocation3], 0  ;;  %s437_s0 = inlined_call_operand.vmem [shape: bf16[16,16], index: 0, kind: input, shape index: {}]   ;;  %s438_s1 = inlined_call_operand.hbm [shape: bf16[16,32], index: 1, kind: input, shape index: {}]   ;;  %s439_s2 = inlined_call_operand.vmem [shape: bf16[32,32], index: 2, kind: input, shape index: {}]   ;;  %s440_s3 = inlined_call_operand.vmem [shape: bf16[32,128], index: 3, kind: input, shape index: {}]   ;;  %s441_s4 = inlined_call_operand.hbm [shape: f32[3,128], index: 4, kind: input, shape index: {}]   ;;  %s442_s5 = inlined_call_operand.vmem [shape: f32[16,128], index: 5, kind: output, shape index: {}]  }
   0x1   :  { %11 = vsyncpa [#allocation5], 0  ;;  %s354_s18 = smov [#allocation2]   ;;  %s306_s22 = scalar_lea.hbm %s438_s1, 128 }
   0x2   :  { %s19_s19 = sshll.u32 %s354_s18, 4  ;;  %p307_p0 = scmp.ne.s32.totalorder %s438_s1, %s306_s22  ;;  %s20_s19 = int_to_ptr.vmem [resolvable:$true] %s19_s19 }
   0x3   :  { %p310_p1 = scmp.lt.u32.totalorder %s306_s22, %s438_s1 }
   0x5   :  { %p312_p2 = pnand %p310_p1, %p307_p0 }
   0x7   :  { %315 = shalt.err (!%p312_p2)
}
   0x8   :  { %s316_s27 = scalar_lea.vmem %s20_s19, 128  ;;  %p321_p4 = scmp.lt.s32.totalorder %s20_s19, %s20_s19 }
   0x9   :  { %p317_p3 = scmp.ne.s32.totalorder %s20_s19, %s316_s27  ;;  %p322_p5 = scmp.lt.s32.totalorder %s316_s27, %s316_s27 }
   0xb   :  { %p323_p6 = por %p322_p5, %p321_p4 }
   0xd   :  { %p324_p7 = pnand %p323_p6, %p317_p3 }
   0xf   :  { %327 = shalt.err (!%p324_p7)
}
  0x10   :  { %s355_s28 = smov 64   ;;  %s356_s29 = smov 4  }
  0x11   :  { %25 = dma.hbm_to_vmem [thread:$0]  %s438_s1, 128, %s20_s19, [#allocation3], %s355_s28, %s355_s28, %s356_s29  }
  0x12   :  { %s357_s7 = smov [#allocation4]   ;;  %s328_s11 = scalar_lea.hbm %s441_s4, 64 }
  0x13   :  { %s36_s8 = sshll.u32 %s357_s7, 4  ;;  %p329_p8 = scmp.ne.s32.totalorder %s441_s4, %s328_s11  ;;  %s37_s8 = int_to_ptr.vmem [resolvable:$true] %s36_s8 }
  0x14   :  { %p332_p9 = scmp.lt.u32.totalorder %s328_s11, %s441_s4 }
  0x16   :  { %p334_p10 = pnand %p332_p9, %p329_p8 }
  0x18   :  { %337 = shalt.err (!%p334_p10)
}
  0x19   :  { %s338_s16 = scalar_lea.vmem %s37_s8, 64  ;;  %p343_p12 = scmp.lt.s32.totalorder %s37_s8, %s37_s8 }
  0x1a   :  { %p339_p11 = scmp.ne.s32.totalorder %s37_s8, %s338_s16  ;;  %p344_p13 = scmp.lt.s32.totalorder %s338_s16, %s338_s16 }
  0x1c   :  { %p345_p0 = por %p344_p13, %p343_p12 }
  0x1e   :  { %p346_p1 = pnand %p345_p0, %p339_p11 }
  0x20   :  { %349 = shalt.err (!%p346_p1)
}
  0x21   :  { %39 = dma.hbm_to_vmem [thread:$0]  %s441_s4, 64, %s37_s8, [#allocation5]  }
  0x22   :  { %350 = dma.done.wait [#allocation3], 128  }
  0x23   :  { %351 = vsyncadd [#allocation3], 4294967168 }
  0x24   :  { %352 = dma.done.wait [#allocation5], 64  }
  0x25   :  { %353 = vsyncadd [#allocation5], 4294967232  ;;  %v358_v0 = vmov 0.0   ;;  %vm359_vm0 = vmmov 0   ;;  %v300_v1 = vld [vmem:[#allocation2] sm:$0xff]   ;;  %vm67_vm1 = vcmask 130048   ;;  %v52_v5 = vlaneseq }
  0x26   :  { %272 = vmatprep.subr.bf16.mxu0 %v358_v0  ;;  %274 = vmatprep.mubr.msk.bf16.mxu0 %vm359_vm0, %v358_v0  ;;  %v301_v2 = vld [vmem:[%s437_s0] sm:$0xff]   ;;  %v303_v4 = vld [vmem:[%s439_s2 + $0x8] sm:$0xff]   ;;  %vm135_vm2 = vcmask 261120  }
  0x27   :  { %278 = vmatprep.subr.bf16.mxu1 %v358_v0  ;;  %282 = vmatprep.mubr.msk.bf16.mxu1 %vm359_vm0, %v358_v0  ;;  %v302_v3 = vld [vmem:[%s439_s2] sm:$0xff]   ;;  %v53_v6 = vshrl.u32 %v52_v5, 7  ;;  %v47_v8 = vld [vmem:[#allocation4] sm:$0x7] }
  0x28   :  { %273 = vmatpush3.bf16.msra.mxu0 %v300_v1  ;;  %279 = vmatpush3.bf16.msra.mxu1 %v302_v3  ;;  %v304_v19 = vld [vmem:[%s440_s3] sm:$0xff]   ;;  %v305_v20 = vld [vmem:[%s440_s3 + $0x8] sm:$0xff]  }
  0x29   :  { %286 = vmatprep.subr.bf16.mxu0 %v358_v0  ;;  %280 = vmatprep.subr.bf16.mxu1 %v358_v0  ;;  %v54_v7 = vsub.s32 0, %v53_v6  ;;  %v121_v21 = vsub.s32 1, %v53_v6  ;;  %v189_v32 = vsub.s32 2, %v53_v6 }
  0x2b   :  { %275 = vmatmul.mubr.msk.bf16.vlgmr.msra.gmra.mrb[0].mxu0 %vm67_vm1, %v301_v2  ;;  %v55_v9 = vrot.slane %v47_v8, %v54_v7  ;;  %v122_v22 = vrot.slane %v47_v8, %v121_v21  ;;  %v190_v33 = vrot.slane %v47_v8, %v189_v32 }
  0x2c   :  { %290 = vmatprep.mubr.msk.bf16.mxu0 %vm359_vm0, %v358_v0  ;;  %281 = vmatpush3.bf16.msra.mxu1 %v303_v4 }
  0x2d   :  { %287 = vmatpush3.bf16.msra.mxu0 %v304_v19 }
  0x2e   :  { %288 = vmatprep.subr.bf16.mxu0 %v358_v0 }
  0x31   :  { %289 = vmatpush3.bf16.msra.mxu0 %v305_v20 }
  0xfe   :  { %v105_v10 = vpop.f32.mrb[0].mxu0 }
  0xff   :  { %v106_v11 = vadd.f32 %v105_v10, %v55_v9  ;;  %v276_v12 = vpop.f32.mrb[1].mxu0 }
 0x100   :  { %v108_v13 = vpop.f32.mrb[2].mxu0 }
 0x101   :  { %v109_v14 = vadd.f32 %v108_v13, %v55_v9  ;;  %v277_v15 = vpop.f32.mrb[3].mxu0  ;;  %v112_v16 = vmax.f32 %v106_v11, 0.0 }
 0x103   :  { %v113_v17 = vmax.f32 %v109_v14, 0.0 }
 0x105   :  { %v114_v18 = vpack.c.bf16 %v113_v17, %v112_v16 }
 0x107   :  { %283 = vmatmul.mubr.msk.bf16.vlgmr.msra.gmra.mrb[0].mxu1 %vm135_vm2, %v114_v18 }
 0x1da   :  { %v173_v23 = vpop.f32.mrb[0].mxu1 }
 0x1db   :  { %v174_v24 = vadd.f32 %v173_v23, %v122_v22  ;;  %v284_v25 = vpop.f32.mrb[1].mxu1 }
 0x1dc   :  { %v176_v26 = vpop.f32.mrb[2].mxu1 }
 0x1dd   :  { %v177_v27 = vadd.f32 %v176_v26, %v122_v22  ;;  %v285_v28 = vpop.f32.mrb[3].mxu1  ;;  %v180_v29 = vmax.f32 %v174_v24, 0.0 }
 0x1df   :  { %v181_v30 = vmax.f32 %v177_v27, 0.0 }
 0x1e1   :  { %v182_v31 = vpack.c.bf16 %v181_v30, %v180_v29 }
 0x1e3   :  { %291 = vmatmul.mubr.msk.bf16.vlgmr.msra.gmra.mrb[4].mxu0 %vm135_vm2, %v182_v31 }
 0x2b6   :  { %v240_v34 = vpop.f32.mrb[4].mxu0 }
 0x2b7   :  { %v241_v35 = vadd.f32 %v240_v34, %v190_v33  ;;  %v292_v36 = vpop.f32.mrb[5].mxu0 }
 0x2b8   :  { %v243_v37 = vpop.f32.mrb[6].mxu0 }
 0x2b9   :  { %247 = vst [vmem:[%s442_s5] sm:$0xff] %v241_v35  ;;  %v244_v38 = vadd.f32 %v243_v37, %v190_v33  ;;  %v293_v39 = vpop.f32.mrb[7].mxu0 }
 0x2bb   :  { %248 = vst [vmem:[%s442_s5 + $0x8] sm:$0xff] %v244_v38 }
 0x2bc   :  { %253 = vsyncpa [#allocation3], 1 }
 0x2bd   :  { %254 = vsyncpa [#allocation5], 1 }

</bundles_post_ra>
